<compile_context>
chip_gen: v5e
topology: v5e:2x2
jax: 0.10.0
libtpu: 0.0.40
codegen_flags: <defaults>
</compile_context>

<pallas_src>
import jax
import jax.numpy as jnp
import jax.scipy.linalg
from jax.experimental import pallas as pl
from jax.experimental.pallas import tpu as pltpu


def _round_up(x, m):
    return ((x + m - 1) // m) * m


def _mlp_kernel(x_ref, w1_ref, b1_ref, w2_ref, b2_ref, w3_ref, b3_ref, o_ref):
    # fc1 + ReLU (matmul dtype follows the (possibly bf16) weights; acc in f32)
    x = x_ref[...].astype(w1_ref.dtype)
    h = jnp.dot(x, w1_ref[...], preferred_element_type=jnp.float32)
    h = jnp.maximum(h + b1_ref[...], 0.0)
    # fc2 + ReLU  (dropout == identity in eval mode)
    h = jnp.dot(h.astype(w2_ref.dtype), w2_ref[...],
                preferred_element_type=jnp.float32)
    h = jnp.maximum(h + b2_ref[...], 0.0)
    # fc3 (log_alpha); concrete_sample == identity in eval mode
    out = jnp.dot(h.astype(w3_ref.dtype), w3_ref[...],
                  preferred_element_type=jnp.float32) + b3_ref[...]
    o_ref[...] = out.astype(o_ref.dtype)


def gpn_forward(edge_feat, params, *, tm=8192, use_bf16=False):
    """edge_feat: [N, dim1]. params: dict of pre-transposed ([in, out]) weights.

    Returns edge_logit: [N, dim3] float32.
    """
    w1, b1, w2, b2, w3, b3 = (
        params["w1"], params["b1"], params["w2"],
        params["b2"], params["w3"], params["b3"],
    )
    N, dim1 = edge_feat.shape
    dim2 = w1.shape[1]
    dim3 = w3.shape[1]

    # ------- lane packing: put `pack` independent rows on the 128-lane axis.
    pack = max(1, 128 // max(dim1, dim2, dim3))
    if pack > 1:
        w1p = jax.scipy.linalg.block_diag(*([w1] * pack))   # (p*d1, p*d2)
        w2p = jax.scipy.linalg.block_diag(*([w2] * pack))   # (p*d2, p*d2)
        w3p = jax.scipy.linalg.block_diag(*([w3] * pack))   # (p*d2, p*d3)
        b1p = jnp.tile(b1, (1, pack))
        b2p = jnp.tile(b2, (1, pack))
        b3p = jnp.tile(b3, (1, pack))
    else:
        w1p, w2p, w3p, b1p, b2p, b3p = w1, w2, w3, b1, b2, b3

    if use_bf16:
        # Weights are tiny and VMEM-resident: cast once here. x is cast in-kernel
        # (or arrives bf16 from the producer); bias add / ReLU stay f32.
        w1p, w2p, w3p = (w.astype(jnp.bfloat16) for w in (w1p, w2p, w3p))

    x = edge_feat
    rem = (-N) % pack
    if rem:  # only a 0..pack-1 row pad; never a full-array repack per tile
        x = jnp.pad(x, ((0, rem), (0, 0)))
    n_rows = (N + rem) // pack
    x = x.reshape(n_rows, pack * dim1)   # free row-major reshape

    # ------- tile selection (packed rows).
    tm = max(8, _round_up(int(tm), 8))
    if n_rows > 16:
        # guarantee >= 2 grid steps so "parallel" can shard across v7x's 2 TCs
        tm = min(tm, _round_up(pl.cdiv(n_rows, 2), 8))
    tm = min(tm, _round_up(n_rows, 8))
    grid = (pl.cdiv(n_rows, tm),)        # ragged last block handled by Pallas

    resident = lambda shape: pl.BlockSpec(shape, lambda i: (0, 0))  # DMA'd once

    out = pl.pallas_call(
        _mlp_kernel,
        out_shape=jax.ShapeDtypeStruct((n_rows, pack * dim3), jnp.float32),
        grid=grid,
        in_specs=[
            pl.BlockSpec((tm, pack * dim1), lambda i: (i, 0)),  # x: streamed tiles
            resident((pack * dim1, pack * dim2)),               # W1 block-diag
            resident((1, pack * dim2)),                         # b1
            resident((pack * dim2, pack * dim2)),               # W2 block-diag
            resident((1, pack * dim2)),                         # b2
            resident((pack * dim2, pack * dim3)),               # W3 block-diag
            resident((1, pack * dim3)),                         # b3
        ],
        out_specs=pl.BlockSpec((tm, pack * dim3), lambda i: (i, 0)),
        compiler_params=pltpu.CompilerParams(
            dimension_semantics=("parallel",),       # megacore on v7x
            vmem_limit_bytes=32 * 1024 * 1024,
        ),
    )(x, w1p, b1p, w2p, b2p, w3p, b3p)

    out = out.reshape(n_rows * pack, dim3)   # free row-major reshape
    if rem:
        out = out[:N]
    return out


def init_params(key, dim1, dim2, dim3=2):
    """Deterministic init mirroring the module: xavier_normal_ weights,
    PyTorch-default uniform(-1/sqrt(fan_in), 1/sqrt(fan_in)) biases."""
    ks = jax.random.split(key, 6)

    def xavier_normal(k, fan_in, fan_out):
        std = (2.0 / (fan_in + fan_out)) ** 0.5
        # stored as [in, out] (transpose of torch's [out, in])
        return std * jax.random.normal(k, (fan_in, fan_out), dtype=jnp.float32)

    def bias(k, fan_in, fan_out):
        bound = 1.0 / (fan_in ** 0.5)
        return jax.random.uniform(
            k, (1, fan_out), dtype=jnp.float32, minval=-bound, maxval=bound
        )

    return {
        "w1": xavier_normal(ks[0], dim1, dim2),
        "b1": bias(ks[1], dim1, dim2),
        "w2": xavier_normal(ks[2], dim2, dim2),
        "b2": bias(ks[3], dim2, dim2),
        "w3": xavier_normal(ks[4], dim2, dim3),
        "b3": bias(ks[5], dim2, dim3),
    }


def reference_forward(x, params):
    h = jnp.maximum(x @ params["w1"] + params["b1"], 0.0)
    h = jnp.maximum(h @ params["w2"] + params["b2"], 0.0)
    return h @ params["w3"] + params["b3"]


if __name__ == "__main__":
    key = jax.random.PRNGKey(0)
    kx, kp, kx2 = jax.random.split(key, 3)

    # Graph_pruning_network(input_dim=32, hidden_dim=32): edge_feat is [N, 32].
    N, dim1, dim2, dim3 = 300, 32, 32, 2
    edge_feat = jax.random.normal(kx, (N, dim1), dtype=jnp.float32)
    params = init_params(kp, dim1, dim2, dim3)

    # f32 path, default (large) tile
    out = gpn_forward(edge_feat, params)
    out = jax.block_until_ready(out)
    ref = reference_forward(edge_feat, params)
    assert out.shape == (N, dim3)
    assert jnp.allclose(out, ref, atol=1e-5, rtol=1e-5), "mismatch vs reference (f32)"

    # second shape: N not a multiple of the pack factor + ragged last grid block
    N2 = 2051
    edge_feat2 = jax.random.normal(kx2, (N2, dim1), dtype=jnp.float32)
    out2 = jax.block_until_ready(gpn_forward(edge_feat2, params))
    ref2 = reference_forward(edge_feat2, params)
    assert out2.shape == (N2, dim3)
    assert jnp.allclose(out2, ref2, atol=1e-5, rtol=1e-5), "mismatch vs reference (ragged)"

    # bf16-matmul path (looser tolerance: bf16 MXU inputs, f32 accumulation)
    out_bf16 = jax.block_until_ready(gpn_forward(edge_feat, params, use_bf16=True))
    assert out_bf16.shape == (N, dim3)
    assert bool(jnp.all(jnp.isfinite(out_bf16)))
    assert float(jnp.max(jnp.abs(out_bf16 - ref))) < 0.25, "bf16 path diverged"

    print("KERNEL_OK")
</pallas_src>

<mosaic_0001>
module attributes {stable_mosaic.version = 11 : i64} {
  func.func @_mlp_kernel(%arg0: i32, %arg1: memref<40x128xf32, #tpu.memory_space<vmem>>, %arg2: memref<128x128xf32, #tpu.memory_space<vmem>>, %arg3: memref<1x128xf32, #tpu.memory_space<vmem>>, %arg4: memref<128x128xf32, #tpu.memory_space<vmem>>, %arg5: memref<1x128xf32, #tpu.memory_space<vmem>>, %arg6: memref<128x8xf32, #tpu.memory_space<vmem>>, %arg7: memref<1x8xf32, #tpu.memory_space<vmem>>, %arg8: memref<40x8xf32, #tpu.memory_space<vmem>>) attributes {dimension_semantics = [#tpu.dimension_semantics<parallel>], iteration_bounds = array<i64: 2>, scalar_prefetch = 0 : i64, scratch_operands = 0 : i64, tpu.core_type = #tpu.core_type<tc>, window_params = [{transform_indices = @transform_0, window_bounds = array<i64: 40, 128>}, {pipeline_mode = #tpu.pipeline_mode<synchronous>, transform_indices = @transform_1, window_bounds = array<i64: 128, 128>}, {pipeline_mode = #tpu.pipeline_mode<synchronous>, transform_indices = @transform_2, window_bounds = array<i64: 1, 128>}, {pipeline_mode = #tpu.pipeline_mode<synchronous>, transform_indices = @transform_3, window_bounds = array<i64: 128, 128>}, {pipeline_mode = #tpu.pipeline_mode<synchronous>, transform_indices = @transform_4, window_bounds = array<i64: 1, 128>}, {pipeline_mode = #tpu.pipeline_mode<synchronous>, transform_indices = @transform_5, window_bounds = array<i64: 128, 8>}, {pipeline_mode = #tpu.pipeline_mode<synchronous>, transform_indices = @transform_6, window_bounds = array<i64: 1, 8>}, {transform_indices = @transform_7, window_bounds = array<i64: 40, 8>}]} {
    %c0 = arith.constant 0 : index
    %c0_0 = arith.constant 0 : index
    %0 = vector.load %arg1[%c0, %c0_0] : memref<40x128xf32, #tpu.memory_space<vmem>>, vector<40x128xf32>
    %c0_1 = arith.constant 0 : index
    %c0_2 = arith.constant 0 : index
    %1 = vector.load %arg2[%c0_1, %c0_2] : memref<128x128xf32, #tpu.memory_space<vmem>>, vector<128x128xf32>
    %cst = arith.constant dense<0.000000e+00> : vector<40x128xf32>
    %2 = tpu.matmul %0, %1, %cst {dimension_numbers = #tpu.dot_dimension_numbers<[1], [0], [0], [1], [0, 0, 1, 1], [], []>} : vector<40x128xf32>, vector<128x128xf32>, vector<40x128xf32> -> vector<40x128xf32>
    %c0_3 = arith.constant 0 : index
    %c0_4 = arith.constant 0 : index
    %3 = vector.load %arg3[%c0_3, %c0_4] : memref<1x128xf32, #tpu.memory_space<vmem>>, vector<1x128xf32>
    %4 = vector.broadcast %3 : vector<1x128xf32> to vector<40x128xf32>
    %5 = arith.addf %2, %4 : vector<40x128xf32>
    %cst_5 = arith.constant 0.000000e+00 : f32
    %6 = vector.broadcast %cst_5 : f32 to vector<40x128xf32>
    %7 = arith.maximumf %5, %6 : vector<40x128xf32>
    %c0_6 = arith.constant 0 : index
    %c0_7 = arith.constant 0 : index
    %8 = vector.load %arg4[%c0_6, %c0_7] : memref<128x128xf32, #tpu.memory_space<vmem>>, vector<128x128xf32>
    %cst_8 = arith.constant dense<0.000000e+00> : vector<40x128xf32>
    %9 = tpu.matmul %7, %8, %cst_8 {dimension_numbers = #tpu.dot_dimension_numbers<[1], [0], [0], [1], [0, 0, 1, 1], [], []>} : vector<40x128xf32>, vector<128x128xf32>, vector<40x128xf32> -> vector<40x128xf32>
    %c0_9 = arith.constant 0 : index
    %c0_10 = arith.constant 0 : index
    %10 = vector.load %arg5[%c0_9, %c0_10] : memref<1x128xf32, #tpu.memory_space<vmem>>, vector<1x128xf32>
    %11 = vector.broadcast %10 : vector<1x128xf32> to vector<40x128xf32>
    %12 = arith.addf %9, %11 : vector<40x128xf32>
    %cst_11 = arith.constant 0.000000e+00 : f32
    %13 = vector.broadcast %cst_11 : f32 to vector<40x128xf32>
    %14 = arith.maximumf %12, %13 : vector<40x128xf32>
    %c0_12 = arith.constant 0 : index
    %c0_13 = arith.constant 0 : index
    %15 = vector.load %arg6[%c0_12, %c0_13] : memref<128x8xf32, #tpu.memory_space<vmem>>, vector<128x8xf32>
    %cst_14 = arith.constant dense<0.000000e+00> : vector<40x8xf32>
    %16 = tpu.matmul %14, %15, %cst_14 {dimension_numbers = #tpu.dot_dimension_numbers<[1], [0], [0], [1], [0, 0, 1, 1], [], []>} : vector<40x128xf32>, vector<128x8xf32>, vector<40x8xf32> -> vector<40x8xf32>
    %c0_15 = arith.constant 0 : index
    %c0_16 = arith.constant 0 : index
    %17 = vector.load %arg7[%c0_15, %c0_16] : memref<1x8xf32, #tpu.memory_space<vmem>>, vector<1x8xf32>
    %18 = vector.broadcast %17 : vector<1x8xf32> to vector<40x8xf32>
    %19 = arith.addf %16, %18 : vector<40x8xf32>
    %c0_17 = arith.constant 0 : index
    %c0_18 = arith.constant 0 : index
    %20 = vector.load %arg8[%c0_17, %c0_18] : memref<40x8xf32, #tpu.memory_space<vmem>>, vector<40x8xf32>
    tpu.vector_store %arg8[%c0_17, %c0_18], %19 {strides = array<i32>} : memref<40x8xf32, #tpu.memory_space<vmem>>, vector<40x8xf32>,
    return
  }
  func.func @transform_0(%arg0: i32) -> (i32, i32) {
    %c0_i32 = arith.constant 0 : i32
    %c0_i32_0 = arith.constant 0 : i32
    return %arg0, %c0_i32 : i32, i32
  }
  func.func @transform_1(%arg0: i32) -> (i32, i32) {
    %c0_i32 = arith.constant 0 : i32
    %c0_i32_0 = arith.constant 0 : i32
    %c0_i32_1 = arith.constant 0 : i32
    return %c0_i32, %c0_i32_0 : i32, i32
  }
  func.func @transform_2(%arg0: i32) -> (i32, i32) {
    %c0_i32 = arith.constant 0 : i32
    %c0_i32_0 = arith.constant 0 : i32
    %c0_i32_1 = arith.constant 0 : i32
    return %c0_i32, %c0_i32_0 : i32, i32
  }
  func.func @transform_3(%arg0: i32) -> (i32, i32) {
    %c0_i32 = arith.constant 0 : i32
    %c0_i32_0 = arith.constant 0 : i32
    %c0_i32_1 = arith.constant 0 : i32
    return %c0_i32, %c0_i32_0 : i32, i32
  }
  func.func @transform_4(%arg0: i32) -> (i32, i32) {
    %c0_i32 = arith.constant 0 : i32
    %c0_i32_0 = arith.constant 0 : i32
    %c0_i32_1 = arith.constant 0 : i32
    return %c0_i32, %c0_i32_0 : i32, i32
  }
  func.func @transform_5(%arg0: i32) -> (i32, i32) {
    %c0_i32 = arith.constant 0 : i32
    %c0_i32_0 = arith.constant 0 : i32
    %c0_i32_1 = arith.constant 0 : i32
    return %c0_i32, %c0_i32_0 : i32, i32
  }
  func.func @transform_6(%arg0: i32) -> (i32, i32) {
    %c0_i32 = arith.constant 0 : i32
    %c0_i32_0 = arith.constant 0 : i32
    %c0_i32_1 = arith.constant 0 : i32
    return %c0_i32, %c0_i32_0 : i32, i32
  }
  func.func @transform_7(%arg0: i32) -> (i32, i32) {
    %c0_i32 = arith.constant 0 : i32
    %c0_i32_0 = arith.constant 0 : i32
    return %arg0, %c0_i32 : i32, i32
  }
}

</mosaic_0001>

<bundles_post_ra>
// kernel: tpu_custom_call.1
= control target key start
LH: loop header
LB: loop body
LE: loop exit
PB: predicated region body
PF: predicated region fallthrough
CT: control target
= control target key end

     0   :  { %12 = vsyncpa [#allocation3], 0  ;;  %s1026_s0 = inlined_call_operand.hbm [shape: f32[75,128], index: 0, kind: input, shape index: {}]   ;;  %s1027_s1 = inlined_call_operand.vmem [shape: f32[128,128], index: 1, kind: input, shape index: {}]   ;;  %s1028_s2 = inlined_call_operand.vmem [shape: f32[1,128], index: 2, kind: input, shape index: {}]   ;;  %s1029_s3 = inlined_call_operand.hbm [shape: f32[128,128], index: 3, kind: input, shape index: {}]   ;;  %s1030_s4 = inlined_call_operand.vmem [shape: f32[1,128], index: 4, kind: input, shape index: {}]   ;;  %s1031_s5 = inlined_call_operand.vmem [shape: f32[128,8], index: 5, kind: input, shape index: {}]   ;;  %s1032_s6 = inlined_call_operand.vmem [shape: f32[1,8], index: 6, kind: input, shape index: {}]   ;;  %s1033_s7 = inlined_call_operand.vmem [shape: f32[75,8], index: 7, kind: output, shape index: {}]  }
   0x1   :  { %14 = vsyncpa [#allocation3 + $0x1], 0 }
   0x2   :  { %15 = vsyncpa [#allocation5], 0  ;;  %s802_s24 = smov 0   ;;  %s804_s25 = smov 0  }
   0x3   :  { %s806_s26 = smov 0   ;;  %s808_s27 = smov 0  }
   0x4 LB: > { %s1034_s28 = sadd.s32 4294967295, %s757_s27   ;;  %p41_p0 = scmp.ne.s32.totalorder %s749_s25, %s745_s24  ;;  %s757_s27 = sphi %s808_s27, %s1047_s27   ;;  %s753_s26 = sphi %s806_s26, %s1046_s26   ;;  %s749_s25 = sphi %s804_s25, %s1045_s25   ;;  %s745_s24 = sphi %s802_s24, %s1044_s24  }
   0x5   : > { %p824_p1 = scmp.eq.s32.totalorder %s1034_s28, 0  ;;  %p576_p2 = scmp.ge.s32.totalorder %s757_s27, 1 }
   0x6   : > { %p204_p3 = scmp.lt.s32.totalorder %s757_s27, 3  ;;  %s221_s10 = sshll.u32 %s1029_s3, 4  ;;  %s222_s10 = int_to_ptr.hbm [resolvable:$true] %s221_s10 }
   0x7   : > { %p832_p4 = por %p824_p1, %p41_p0  ;;  %s759_s12 = smov [#allocation4]  }
   0x8   : > { %p839_p5 = pnand %p576_p2, %p204_p3  ;;  %s223_s13 = sshll.u32 %s759_s12, 4  ;;  %s224_s13 = int_to_ptr.vmem [resolvable:$true] %s223_s13 }
   0x9   : > { %s848_s14 = sadd.s32 1, %s757_s27   ;;  %s1035_s15 = smov 128  }
   0xa   : > { %p610_p6 = pneg %p839_p5  ;;  %s1036_s16 = smov 8  }
   0xb   : > { %s25_s17 = ssub.s32 %s757_s27, %s848_s14  ;;  %s28_s18 = sadd.s32 1, %s753_s26 }
   0xc   : > { %p611_p7 = pnand %p610_p6, %p824_p1  ;;  %p26_p8 = scmp.eq.s32.totalorder %s25_s17, 0 }
   0xd   : > { %p35_p9 = scmp.ne.s32.totalorder %s753_s26, %s749_s25  ;;  %p36_p10 = scmp.eq.s32.totalorder %s757_s27, 0 }
   0xe   : > { %613 = dma.hbm_to_vmem [thread:$0]  (!%p611_p7), %s222_s10, 2048, %s224_s13, [#allocation5], %s1035_s15, %s1035_s15, %s1036_s16  }
   0xf   : > { %p619_p11 = scmp.lt.s32.totalorder %s757_s27, 2  ;;  %p37_p12 = por %p36_p10, %p35_p9 }
  0x10   : > { %s861_s19 = scalar_select %p26_p8, %s753_s26, %s28_s18  }
  0x11   : > { %s246_s20 = sand.u32 1, %s753_s26   ;;  %s585_s22 = smul.u32 40, %s757_s27 }
  0x12   : > { %s602_s21 = smul.u32 40, %s246_s20  ;;  %p865_p13 = pnand %p619_p11, %p37_p12 }
  0x13   : > { %s255_s9 = scalar_lea.hbm %s1026_s0, %s585_s22  ;;  %s247_s17 = scalar_lea.sflag [#allocation3], %s246_s20 }
  0x14   : > { %s250_s10 = scalar_lea.vmem [#allocation2], %s602_s21  ;;  %s256_s13 = sshll.u32 %s255_s9, 4  ;;  %s257_s13 = int_to_ptr.hbm [resolvable:$true] %s256_s13 }
  0x15   : > { %s258_s12 = sshll.u32 %s250_s10, 4  ;;  %s689_s18 = sshra.s32 %s257_s13, 4  ;;  %s259_s12 = int_to_ptr.vmem [resolvable:$true] %s258_s12  ;;  %s690_s18 = int_to_ptr.hbm [resolvable:$true] %s689_s18 }
  0x16   : > { %s691_s28 = scalar_lea.hbm %s690_s18, 40  ;;  %p693_p2 = pneg %p865_p13 }
  0x17   : > { %p692_p0 = scmp.ne.s32.totalorder %s690_s18, %s691_s28  ;;  %s696_s24 = scalar_lea.hbm %s1026_s0, 80 }
  0x18   : > { %p697_p7 = scmp.lt.s32.totalorder %s690_s18, %s1026_s0  ;;  %p698_p8 = scmp.lt.s32.totalorder %s696_s24, %s691_s28 }
  0x19   : > { %p694_p3 = pnand %p693_p2, %p692_p0 }
  0x1a   : > { %p699_p9 = por %p698_p8, %p697_p7 }
  0x1b   : > { %p695_p6 = pneg %p694_p3 }
  0x1d   : > { %p700_p10 = pnand %p699_p9, %p695_p6 }
  0x1f   : > { %703 = shalt.err (!%p700_p10)
}
  0x20   : > { %s1041_s20 = smov 8   ;;  %s1042_s21 = smov 128  }
  0x21   : > { %617 = dma.hbm_to_vmem [thread:$0]  (!%p865_p13), %s257_s13, 640, %s259_s12, %s247_s17, %s1042_s21, %s1042_s21, %s1041_s20  }
  0x22   : > { %270 = sbr.rel (%p839_p5) target bundleno = 501 (0x1f5), region = 48  ;;  %s272_s15 = sand.u32 (!%p839_p5), 1, %s749_s25  }
  0x23   : > { %s603_s16 = smul.u32 (!%p839_p5), 40, %s272_s15  ;;  %s273_s9 = scalar_lea.sflag (!%p839_p5), [#allocation3], %s272_s15 }
  0x25   : > { %s888_s10 = scalar_lea.vmem (!%p839_p5), [#allocation2], %s603_s16 }
  0x27   : > { %736 = dma.done.wait (%p832_p4), %s273_s9, 640  }
  0x28   : > { %738 = vsyncadd (%p832_p4), %s273_s9, 4294966656 }
  0x29   : > { %740 = dma.done.wait (%p824_p1), [#allocation5], 2048  }
  0x2a   : > { %742 = vsyncadd (%p824_p1), [#allocation5], 4294965248  ;;  %v340_v0 = vld [vmem:[%s1027_s1 + $0x78] sm:$0xff]  ;;  %v339_v1 = vld [vmem:[%s1027_s1 + $0x70] sm:$0xff]  ;;  %s1043_s16 = sadd.s32 4294967295, %s757_s27   ;;  %vm491_vm0 = vcmask 64512  }
  0x2b   : > { %345 = vmatpush.msra.mxu0 %v340_v0  ;;  %586 = vmatpush.msra.mxu3 %v340_v0  ;;  %v338_v2 = vld [vmem:[%s1027_s1 + $0x68] sm:$0xff]  ;;  %v337_v3 = vld [vmem:[%s1027_s1 + $0x60] sm:$0xff]  ;;  %v336_v4 = vld [vmem:[%s1027_s1 + $0x58] sm:$0xff]  ;;  %s314_s9 = smul.u32 5, %s1043_s16 }
  0x2c   : > { %v335_v5 = vld [vmem:[%s1027_s1 + $0x50] sm:$0xff]  ;;  %v334_v6 = vld [vmem:[%s1027_s1 + $0x48] sm:$0xff]  ;;  %v333_v7 = vld [vmem:[%s1027_s1 + $0x40] sm:$0xff] }
  0x2d   : > { %346 = vmatpush.msra.mxu0 %v339_v1  ;;  %587 = vmatpush.msra.mxu3 %v339_v1  ;;  %v332_v8 = vld [vmem:[%s1027_s1 + $0x38] sm:$0xff]  ;;  %v331_v9 = vld [vmem:[%s1027_s1 + $0x30] sm:$0xff]  ;;  %v330_v10 = vld [vmem:[%s1027_s1 + $0x28] sm:$0xff]  ;;  %p315_p1 = scmp.lt.s32.totalorder %s314_s9, 9 }
  0x2e   : > { %v329_v11 = vld [vmem:[%s1027_s1 + $0x20] sm:$0xff]  ;;  %v328_v12 = vld [vmem:[%s1027_s1 + $0x18] sm:$0xff]  ;;  %v327_v13 = vld [vmem:[%s1027_s1 + $0x10] sm:$0xff] }
  0x2f   : > { %347 = vmatpush.msra.mxu0 %v338_v2  ;;  %588 = vmatpush.msra.mxu3 %v338_v2  ;;  %v397_v14 = vld [vmem:[#allocation4 + $0x78] sm:$0xff]  ;;  %v396_v15 = vld [vmem:[#allocation4 + $0x70] sm:$0xff]  ;;  %v395_v17 = vld [vmem:[#allocation4 + $0x68] sm:$0xff]  ;;  %s1049_s9 = smov (!%p315_p1, %s314_s9), 9 }
  0x30   : > { %v326_v16 = vld [vmem:[%s1027_s1 + $0x8] sm:$0xff]  ;;  %402 = vmatpush.msra.mxu1 %v397_v14  ;;  %v325_v18 = vld [vmem:[%s1027_s1] sm:$0xff]  ;;  %v394_v21 = vld [vmem:[#allocation4 + $0x60] sm:$0xff]  ;;  %s582_s28 = sshll.u32 %s1049_s9, 3 }
  0x31   : > { %348 = vmatpush.msra.mxu0 %v337_v3  ;;  %589 = vmatpush.msra.mxu3 %v337_v3  ;;  %v320_v19 = vld [vmem:[%s888_s10] sm:$0xff]  ;;  %v321_v20 = vld [vmem:[%s888_s10 + $0x8] sm:$0xff]  ;;  %v391_v24 = vld [vmem:[#allocation4 + $0x48] sm:$0xff]  ;;  %s318_s13 = scalar_lea.vmem %s1033_s7, %s582_s28 }
  0x32   : > { %403 = vmatpush.msra.mxu1 %v396_v15  ;;  %v393_v22 = vld [vmem:[#allocation4 + $0x58] sm:$0xff]  ;;  %v392_v23 = vld [vmem:[#allocation4 + $0x50] sm:$0xff]  ;;  %v322_v25 = vld [vmem:[%s888_s10 + $0x10] sm:$0xff] }
  0x33   : > { %349 = vmatpush.msra.mxu0 %v336_v4  ;;  %590 = vmatpush.msra.mxu3 %v336_v4  ;;  %v390_v26 = vld [vmem:[#allocation4 + $0x40] sm:$0xff]  ;;  %v389_v27 = vld [vmem:[#allocation4 + $0x38] sm:$0xff]  ;;  %v388_v28 = vld [vmem:[#allocation4 + $0x30] sm:$0xff] }
  0x34   : > { %404 = vmatpush.msra.mxu1 %v395_v17  ;;  %v387_v29 = vld [vmem:[#allocation4 + $0x28] sm:$0xff]  ;;  %v386_v31 = vld [vmem:[#allocation4 + $0x20] sm:$0xff]  ;;  %v385_v32 = vld [vmem:[#allocation4 + $0x18] sm:$0xff] }
  0x35   : > { %350 = vmatpush.msra.mxu0 %v335_v5  ;;  %591 = vmatpush.msra.mxu3 %v335_v5  ;;  %v323_v30 = vld [vmem:[%s888_s10 + $0x18] sm:$0xff]  ;;  %v324_v33 = vld [vmem:[%s888_s10 + $0x20] sm:$0xff]  ;;  %v382_v36 = vld [vmem:[#allocation4] sm:$0xff] }
  0x36   : > { %405 = vmatpush.msra.mxu1 %v394_v21  ;;  %v384_v34 = vld [vmem:[#allocation4 + $0x10] sm:$0xff]  ;;  %v383_v35 = vld [vmem:[#allocation4 + $0x8] sm:$0xff]  ;;  %v453_v42 = vld [vmem:[%s1031_s5 + $0x70] sm:$0xff] }
  0x37   : > { %351 = vmatpush.msra.mxu0 %v334_v6  ;;  %592 = vmatpush.msra.mxu3 %v334_v6  ;;  %v656_v37 = vld [vmem:[%s1028_s2] ss:$0 sm:$0xff]  ;;  %v454_v41 = vld [vmem:[%s1031_s5 + $0x78] sm:$0xff]  ;;  %v452_v45 = vld [vmem:[%s1031_s5 + $0x68] sm:$0xff] }
  0x38   : > { %406 = vmatpush.msra.mxu1 %v393_v22  ;;  %459 = vmatpush.msra.mxu2 %v454_v41  ;;  %v451_v47 = vld [vmem:[%s1031_s5 + $0x60] sm:$0xff]  ;;  %v450_v48 = vld [vmem:[%s1031_s5 + $0x58] sm:$0xff]  ;;  %v449_v49 = vld [vmem:[%s1031_s5 + $0x50] sm:$0xff] }
  0x39   : > { %352 = vmatpush.msra.mxu0 %v333_v7  ;;  %593 = vmatpush.msra.mxu3 %v333_v7  ;;  %v448_v52 = vld [vmem:[%s1031_s5 + $0x48] sm:$0xff]  ;;  %v447_v54 = vld [vmem:[%s1031_s5 + $0x40] sm:$0xff]  ;;  %v446_v55 = vld [vmem:[%s1031_s5 + $0x38] sm:$0xff] }
  0x3a   : > { %407 = vmatpush.msra.mxu1 %v392_v23  ;;  %460 = vmatpush.msra.mxu2 %v453_v42  ;;  %v445_v56 = vld [vmem:[%s1031_s5 + $0x30] sm:$0xff]  ;;  %v444_v59 = vld [vmem:[%s1031_s5 + $0x28] sm:$0xff]  ;;  %v443_v61 = vld [vmem:[%s1031_s5 + $0x20] sm:$0xff] }
  0x3b   : > { %353 = vmatpush.msra.mxu0 %v332_v8  ;;  %594 = vmatpush.msra.mxu3 %v332_v8  ;;  %v442_v62 = vld [vmem:[%s1031_s5 + $0x18] sm:$0xff]  ;;  %v441_v2 = vld [vmem:[%s1031_s5 + $0x10] sm:$0xff]  ;;  %v440_v3 = vld [vmem:[%s1031_s5 + $0x8] sm:$0xff] }
  0x3c   : > { %408 = vmatpush.msra.mxu1 %v391_v24  ;;  %461 = vmatpush.msra.mxu2 %v452_v45  ;;  %v439_v4 = vld [vmem:[%s1031_s5] sm:$0xff] }
  0x3d   : > { %354 = vmatpush.msra.mxu0 %v331_v9  ;;  %595 = vmatpush.msra.mxu3 %v331_v9  ;;  %v657_v5 = vld [vmem:[%s1030_s4] ss:$0 sm:$0xff] }
  0x3e   : > { %409 = vmatpush.msra.mxu1 %v390_v26  ;;  %462 = vmatpush.msra.mxu2 %v451_v47  ;;  %v658_v21 = vld [vmem:[%s1032_s6] ss:$0 sm:$0xff] }
  0x3f   : > { %355 = vmatpush.msra.mxu0 %v330_v10  ;;  %596 = vmatpush.msra.mxu3 %v330_v10 }
  0x40   : > { %410 = vmatpush.msra.mxu1 %v389_v27  ;;  %463 = vmatpush.msra.mxu2 %v450_v48 }
  0x41   : > { %356 = vmatpush.msra.mxu0 %v329_v11  ;;  %597 = vmatpush.msra.mxu3 %v329_v11 }
  0x42   : > { %411 = vmatpush.msra.mxu1 %v388_v28  ;;  %464 = vmatpush.msra.mxu2 %v449_v49 }
  0x43   : > { %357 = vmatpush.msra.mxu0 %v328_v12  ;;  %598 = vmatpush.msra.mxu3 %v328_v12 }
  0x44   : > { %412 = vmatpush.msra.mxu1 %v387_v29  ;;  %465 = vmatpush.msra.mxu2 %v448_v52 }
  0x45   : > { %358 = vmatpush.msra.mxu0 %v327_v13  ;;  %599 = vmatpush.msra.mxu3 %v327_v13 }
  0x46   : > { %413 = vmatpush.msra.mxu1 %v386_v31  ;;  %466 = vmatpush.msra.mxu2 %v447_v54 }
  0x47   : > { %359 = vmatpush.msra.mxu0 %v326_v16  ;;  %600 = vmatpush.msra.mxu3 %v326_v16 }
  0x48   : > { %414 = vmatpush.msra.mxu1 %v385_v32  ;;  %467 = vmatpush.msra.mxu2 %v446_v55 }
  0x49   : > { %360 = vmatpush.msra.mxu0 %v325_v18  ;;  %601 = vmatpush.msra.mxu3 %v325_v18 }
  0x4a   : > { %361 = vmatmul.f32.vlgmr.msra.gmra.mxu0 %v320_v19  ;;  %364 = vmatmul.f32.vlgmr.msra.gmra.mxu3 %v321_v20 }
  0x4b   : > { %415 = vmatpush.msra.mxu1 %v384_v34  ;;  %468 = vmatpush.msra.mxu2 %v445_v56 }
  0x4d   : > { %416 = vmatpush.msra.mxu1 %v383_v35  ;;  %469 = vmatpush.msra.mxu2 %v444_v59 }
  0x4f   : > { %417 = vmatpush.msra.mxu1 %v382_v36  ;;  %470 = vmatpush.msra.mxu2 %v443_v61 }
  0x51   : > { %471 = vmatpush.msra.mxu2 %v442_v62 }
  0x52   : > { %367 = vmatmul.f32.gmra.mxu3 %v322_v25 }
  0x53   : > { %472 = vmatpush.msra.mxu2 %v441_v2 }
  0x55   : > { %473 = vmatpush.msra.mxu2 %v440_v3 }
  0x57   : > { %474 = vmatpush.msra.mxu2 %v439_v4 }
  0x5a   : > { %370 = vmatmul.f32.gmra.mxu3 %v323_v30 }
  0x62   : > { %373 = vmatmul.f32.gmra.mxu3 %v324_v33 }
  0xc7   : > { %v362_v38 = vpop.f32.mrf.mxu0 }
  0xc8   : > { %v363_v39 = vadd.f32 %v656_v37, %v362_v38 }
  0xca   : > { %v377_v40 = vmax.f32 %v363_v39, 0.0 }
  0xcc   : > { %418 = vmatmul.f32.vlgmr.msra.gmra.mxu1 %v377_v40 }
  0xcd   : > { %v365_v43 = vpop.f32.mrf.mxu3 }
  0xce   : > { %v366_v44 = vadd.f32 %v656_v37, %v365_v43 }
  0xd0   : > { %v378_v46 = vmax.f32 %v366_v44, 0.0 }
  0xd4   : > { %421 = vmatmul.f32.gmra.mxu1 %v378_v46 }
  0xd5   : > { %v368_v50 = vpop.f32.mrf.mxu3 }
  0xd6   : > { %v369_v51 = vadd.f32 %v656_v37, %v368_v50 }
  0xd8   : > { %v379_v53 = vmax.f32 %v369_v51, 0.0 }
  0xdc   : > { %424 = vmatmul.f32.gmra.mxu1 %v379_v53 }
  0xdd   : > { %v371_v57 = vpop.f32.mrf.mxu3 }
  0xde   : > { %v372_v58 = vadd.f32 %v656_v37, %v371_v57 }
  0xe0   : > { %v380_v60 = vmax.f32 %v372_v58, 0.0 }
  0xe4   : > { %427 = vmatmul.f32.gmra.mxu1 %v380_v60 }
  0xe5   : > { %v374_v63 = vpop.f32.mrf.mxu3 }
  0xe6   : > { %v375_v0 = vadd.f32 %v656_v37, %v374_v63 }
  0xe8   : > { %v381_v1 = vmax.f32 %v375_v0, 0.0 }
  0xec   : > { %430 = vmatmul.f32.gmra.mxu1 %v381_v1 }
 0x149   : > { %v419_v6 = vpop.f32.mrf.mxu1 }
 0x14a   : > { %v420_v7 = vadd.f32 %v657_v5, %v419_v6 }
 0x14c   : > { %v434_v8 = vmax.f32 %v420_v7, 0.0 }
 0x14e   : > { %475 = vmatmul.f32.vlgmr.msra.gmra.mxu2 %v434_v8 }
 0x151   : > { %v422_v9 = vpop.f32.mrf.mxu1 }
 0x152   : > { %v423_v10 = vadd.f32 %v657_v5, %v422_v9 }
 0x154   : > { %v435_v11 = vmax.f32 %v423_v10, 0.0 }
 0x156   : > { %478 = vmatmul.f32.gmra.mxu2 %v435_v11 }
 0x159   : > { %v425_v12 = vpop.f32.mrf.mxu1 }
 0x15a   : > { %v426_v13 = vadd.f32 %v657_v5, %v425_v12 }
 0x15c   : > { %v436_v14 = vmax.f32 %v426_v13, 0.0 }
 0x15e   : > { %481 = vmatmul.f32.gmra.mxu2 %v436_v14 }
 0x161   : > { %v428_v15 = vpop.f32.mrf.mxu1 }
 0x162   : > { %v429_v16 = vadd.f32 %v657_v5, %v428_v15 }
 0x164   : > { %v437_v17 = vmax.f32 %v429_v16, 0.0 }
 0x166   : > { %484 = vmatmul.f32.gmra.mxu2 %v437_v17 }
 0x169   : > { %v431_v18 = vpop.f32.mrf.mxu1 }
 0x16a   : > { %v432_v19 = vadd.f32 %v657_v5, %v431_v18 }
 0x16c   : > { %v438_v20 = vmax.f32 %v432_v19, 0.0 }
 0x16e   : > { %487 = vmatmul.f32.gmra.mxu2 %v438_v20 }
 0x1d1   : > { %v476_v22 = vpop.f32.mrf.mxu2 }
 0x1d2   : > { %v477_v23 = vadd.f32 %v658_v21, %v476_v22 }
 0x1d4   : > { %492 = vst.msk [vmem:[%s318_s13] sm:$0xff] %vm491_vm0, %v477_v23 }
 0x1d9   : > { %v479_v24 = vpop.f32.mrf.mxu2 }
 0x1da   : > { %v480_v25 = vadd.f32 %v658_v21, %v479_v24 }
 0x1dc   : > { %493 = vst.msk [vmem:[%s318_s13 + $0x8] sm:$0xff] %vm491_vm0, %v480_v25 }
 0x1e1   : > { %v482_v26 = vpop.f32.mrf.mxu2 }
 0x1e2   : > { %v483_v27 = vadd.f32 %v658_v21, %v482_v26 }
 0x1e4   : > { %494 = vst.msk [vmem:[%s318_s13 + $0x10] sm:$0xff] %vm491_vm0, %v483_v27 }
 0x1e9   : > { %v485_v28 = vpop.f32.mrf.mxu2 }
 0x1ea   : > { %v486_v29 = vadd.f32 %v658_v21, %v485_v28 }
 0x1ec   : > { %495 = vst.msk [vmem:[%s318_s13 + $0x18] sm:$0xff] %vm491_vm0, %v486_v29 }
 0x1f1   : > { %v488_v30 = vpop.f32.mrf.mxu2 }
 0x1f2   : > { %v489_v31 = vadd.f32 %v658_v21, %v488_v30 }
 0x1f4   : > { %496 = vst.msk [vmem:[%s318_s13 + $0x20] sm:$0xff] %vm491_vm0, %v489_v31 }
 0x1f5 PF: > { %p18_p4 = scmp.ge.s32.totalorder %s848_s14, 4   ;;  %s1044_s24 = smov %s749_s25 }
 0x1f6   : > { %s1045_s25 = smov %s753_s26  ;;  %s1046_s26 = smov %s861_s19 }
 0x1f7   : > { %s1047_s27 = smov %s848_s14  ;;  %20 = sbr.rel (!%p18_p4) target bundleno = 4 (0x4), region = 92 }
 0x1fc   :  { %519 = vsyncpa [#allocation3], 1 }
 0x1fd   :  { %521 = vsyncpa [#allocation3 + $0x1], 1 }
 0x1fe   :  { %522 = vsyncpa [#allocation5], 1 }

</bundles_post_ra>
